<compile_context>
chip_gen: v7x
topology: tpu7x:2x2x1
jax: 0.10.0
libtpu: 0.0.40
codegen_flags: <defaults>
</compile_context>

<pallas_src>
import functools
import math

import jax
import jax.numpy as jnp
from jax import lax
from jax.experimental import pallas as pl
from jax.experimental.pallas import tpu as pltpu

# Raised scoped-VMEM budget (defaults: 16 MiB v5e / 32 MiB v6e,v7x); kept
# under 64 MiB so it is still valid on v7x.
_VMEM_LIMIT = 48 * 1024 * 1024


def _pick_tile(dim, preferred, align):
    """Largest multiple of `align` <= `preferred` that divides `dim`,
    falling back to the full dim (always a legal block size)."""
    if dim <= preferred:
        return dim
    t = (preferred // align) * align
    while t >= align:
        if dim % t == 0:
            return t
        t -= align
    return dim


# ---------------------------------------------------------------------------
# Tiled linear projection kernel: out = x @ W_t + b   (PyTorch nn.Linear,
# weight pre-transposed to (in, out) so no in-kernel transpose is needed)
# ---------------------------------------------------------------------------
def _linear_kernel(x_ref, w_ref, b_ref, o_ref, acc_ref, *, compute_dtype):
    k = pl.program_id(2)

    @pl.when(k == 0)
    def _():
        acc_ref[...] = jnp.zeros_like(acc_ref)

    acc_ref[...] += jnp.dot(
        x_ref[...].astype(compute_dtype),
        w_ref[...].astype(compute_dtype),
        preferred_element_type=jnp.float32,
    )

    @pl.when(k == pl.num_programs(2) - 1)
    def _():
        o_ref[...] = (acc_ref[...] + b_ref[...]).astype(o_ref.dtype)


def linear(x2d, w_t, bias, *, compute_dtype=jnp.float32):
    """x2d: (M, K) f32, w_t: (K, N) pre-transposed, bias: (N,) -> (M, N)."""
    M, K = x2d.shape
    N = w_t.shape[1]
    tm = _pick_tile(M, 512, 8)
    tn = _pick_tile(N, 512, 128)
    tk = _pick_tile(K, 1024, 128)
    b2 = bias.reshape(1, N)
    kern = functools.partial(_linear_kernel, compute_dtype=compute_dtype)
    return pl.pallas_call(
        kern,
        out_shape=jax.ShapeDtypeStruct((M, N), jnp.float32),
        grid=(M // tm, N // tn, K // tk),
        in_specs=[
            pl.BlockSpec((tm, tk), lambda i, j, k: (i, k)),
            pl.BlockSpec((tk, tn), lambda i, j, k: (k, j)),
            pl.BlockSpec((1, tn), lambda i, j, k: (0, j)),
        ],
        out_specs=pl.BlockSpec((tm, tn), lambda i, j, k: (i, j)),
        scratch_shapes=[pltpu.VMEM((tm, tn), jnp.float32)],
        compiler_params=pltpu.CompilerParams(
            dimension_semantics=("parallel", "parallel", "arbitrary"),
            vmem_limit_bytes=_VMEM_LIMIT,
        ),
    )(x2d, w_t, b2)


# ---------------------------------------------------------------------------
# Fused projection kernel with multiple outputs: one x @ W_fused matmul, the
# accumulator is split into q/k/v (or k/v) outputs inside the kernel -> no
# host-side slicing of the fused activation (no extra HBM passes).
# ---------------------------------------------------------------------------
def _linear_split_kernel(x_ref, w_ref, b_ref, *rest, splits, compute_dtype):
    outs = rest[:-1]
    acc_ref = rest[-1]
    k = pl.program_id(1)

    @pl.when(k == 0)
    def _():
        acc_ref[...] = jnp.zeros_like(acc_ref)

    acc_ref[...] += jnp.dot(
        x_ref[...].astype(compute_dtype),
        w_ref[...].astype(compute_dtype),
        preferred_element_type=jnp.float32,
    )

    @pl.when(k == pl.num_programs(1) - 1)
    def _():
        full = acc_ref[...] + b_ref[...]
        off = 0
        for o_ref, n in zip(outs, splits):
            o_ref[...] = full[:, off:off + n].astype(o_ref.dtype)
            off += n


def linear_split(x2d, w_t, bias, splits, *, compute_dtype=jnp.float32):
    """x2d: (M, K), w_t: (K, sum(splits)), bias: (sum(splits),).
    Returns a tuple of (M, n_i) arrays, one per split."""
    M, K = x2d.shape
    Nt = w_t.shape[1]
    assert sum(splits) == Nt
    tm = _pick_tile(M, 256, 8)
    tk = _pick_tile(K, 512, 128)
    b2 = bias.reshape(1, Nt)
    kern = functools.partial(
        _linear_split_kernel, splits=tuple(splits), compute_dtype=compute_dtype
    )
    out_shapes = tuple(jax.ShapeDtypeStruct((M, n), jnp.float32) for n in splits)
    return pl.pallas_call(
        kern,
        out_shape=out_shapes,
        grid=(M // tm, K // tk),
        in_specs=[
            pl.BlockSpec((tm, tk), lambda i, k: (i, k)),
            pl.BlockSpec((tk, Nt), lambda i, k: (k, 0)),
            pl.BlockSpec((1, Nt), lambda i, k: (0, 0)),
        ],
        out_specs=tuple(
            pl.BlockSpec((tm, n), lambda i, k: (i, 0)) for n in splits
        ),
        scratch_shapes=[pltpu.VMEM((tm, Nt), jnp.float32)],
        compiler_params=pltpu.CompilerParams(
            dimension_semantics=("parallel", "arbitrary"),
            vmem_limit_bytes=_VMEM_LIMIT,
        ),
    )(x2d, w_t, b2)


# ---------------------------------------------------------------------------
# Attention core kernel: one (batch, q-row-tile) per grid step.  Heads are a
# static in-kernel loop over static lane slices; each head's context is
# stored directly into its lane slice of the ctx block.
# ---------------------------------------------------------------------------
def _attn_kernel(*refs, num_heads, d_kv, scale, has_mask, mask_heads,
                 compute_dtype):
    if has_mask:
        q_ref, k_ref, v_ref, m_ref, attn_ref, ctx_ref = refs
    else:
        q_ref, k_ref, v_ref, attn_ref, ctx_ref = refs
        m_ref = None

    # Fold 1/sqrt(d_kv) into q once: VALU work ~ tq*inner, not H*tq*Sk.
    q_all = q_ref[...] * scale

    for h in range(num_heads):                     # static unroll over heads
        lo, hi = h * d_kv, (h + 1) * d_kv
        q = q_all[:, lo:hi].astype(compute_dtype)  # (tq, Dk) static lane slice
        k = k_ref[:, lo:hi].astype(compute_dtype)  # (Sk, Dk)
        v = v_ref[:, lo:hi].astype(compute_dtype)  # (Sk, Dk)
        # scores = q @ k^T without an in-kernel transpose (contract last dims)
        s = lax.dot_general(
            q, k, dimension_numbers=(((1,), (1,)), ((), ())),
            preferred_element_type=jnp.float32,
        )
        if m_ref is not None:
            # mask kept at natural shape; broadcasts across q/k rows on the VPU
            s = s + m_ref[h if mask_heads == num_heads else 0]
        # numerically stable softmax along the last axis
        mx = jnp.max(s, axis=-1, keepdims=True)
        p = jnp.exp(s - mx)
        denom = jnp.sum(p, axis=-1, keepdims=True)
        w = p * pl.reciprocal(denom, approx=False)
        attn_ref[h] = w                            # lane-dense (tq, Sk) store
        # direct per-head context store: no H-way concatenation, only one
        # head's (tq, Dk) result is live at a time.
        ctx_ref[:, lo:hi] = jnp.dot(
            w.astype(compute_dtype), v, preferred_element_type=jnp.float32
        )


def attention_core(q3, k3, v3, mask, *, num_heads, d_kv,
                   compute_dtype=jnp.float32):
    """q3: (B, Sq, H*Dk), k3/v3: (B, Sk, H*Dk); mask: None or broadcastable to
    (B, H, Sq, Sk).  Returns (attn (B,H,Sq,Sk), ctx (B,Sq,H*Dk))."""
    B, Sq, inner = q3.shape
    Sk = k3.shape[1]
    scale = 1.0 / math.sqrt(float(d_kv))
    has_mask = mask is not None

    tq = _pick_tile(Sq, 128, 8)
    nq = Sq // tq

    in_specs = [
        pl.BlockSpec((None, tq, inner), lambda b, qi: (b, qi, 0)),
        pl.BlockSpec((None, Sk, inner), lambda b, qi: (b, 0, 0)),   # resident
        pl.BlockSpec((None, Sk, inner), lambda b, qi: (b, 0, 0)),   # across qi
    ]
    args = [q3, k3, v3]
    mask_heads = 1
    if has_mask:
        # Canonicalize to rank-4 WITHOUT materializing a (B,H,Sq,Sk) broadcast.
        m4 = jnp.asarray(mask, jnp.float32)
        m4 = m4.reshape((1,) * (4 - m4.ndim) + m4.shape)
        mb, mh, mq, mk = m4.shape
        assert mb in (1, B) and mh in (1, num_heads)
        assert mq in (1, Sq) and mk in (1, Sk)
        mask_heads = mh
        tq_m = tq if mq == Sq else 1

        def m_index(b, qi, _b=(mb == B), _q=(mq == Sq)):
            return (b if _b else 0, 0, qi if _q else 0, 0)

        in_specs.append(pl.BlockSpec((None, mh, tq_m, mk), m_index))
        args.append(m4)

    kern = functools.partial(
        _attn_kernel, num_heads=num_heads, d_kv=d_kv, scale=scale,
        has_mask=has_mask, mask_heads=mask_heads, compute_dtype=compute_dtype,
    )

    attn, ctx = pl.pallas_call(
        kern,
        out_shape=(
            jax.ShapeDtypeStruct((B, num_heads, Sq, Sk), jnp.float32),
            jax.ShapeDtypeStruct((B, Sq, inner), jnp.float32),
        ),
        grid=(B, nq),
        in_specs=in_specs,
        out_specs=[
            pl.BlockSpec((None, num_heads, tq, Sk), lambda b, qi: (b, 0, qi, 0)),
            pl.BlockSpec((None, tq, inner), lambda b, qi: (b, qi, 0)),
        ],
        compiler_params=pltpu.CompilerParams(
            dimension_semantics=("parallel", "parallel"),
            vmem_limit_bytes=_VMEM_LIMIT,
        ),
    )(*args)
    return attn, ctx


# ---------------------------------------------------------------------------
# One-time parameter preparation (hoisted out of the forward call):
# pre-transpose to (in, out) and pre-fuse qkv / kv weights & biases.
# ---------------------------------------------------------------------------
def prepare_params(raw):
    return {
        "w_q_t": raw["wq"].T, "b_q": raw["bq"],
        "w_k_t": raw["wk"].T, "b_k": raw["bk"],
        "w_v_t": raw["wv"].T, "b_v": raw["bv"],
        "w_o_t": raw["wo"].T, "b_o": raw["bo"],
        "w_qkv_t": jnp.concatenate([raw["wq"], raw["wk"], raw["wv"]], axis=0).T,
        "b_qkv": jnp.concatenate([raw["bq"], raw["bk"], raw["bv"]], axis=0),
        "w_kv_t": jnp.concatenate([raw["wk"], raw["wv"]], axis=0).T,
        "b_kv": jnp.concatenate([raw["bk"], raw["bv"]], axis=0),
    }


# ---------------------------------------------------------------------------
# Full MHA forward (glue in plain JAX, hot paths in Pallas)
# ---------------------------------------------------------------------------
def multi_head_attention(prepared, query, key, value, mask=None,
                         *, d_model, d_kv, num_heads,
                         compute_dtype=jnp.float32):
    B, Sq, _ = query.shape
    Sk = key.shape[1]
    inner = num_heads * d_kv

    def flat(x):
        b, s, f = x.shape
        return x.reshape(b * s, f)

    # NOTE: fusion keys off Python object identity; equal-but-distinct arrays
    # fall back to separate projections (perf, not numerics, difference).
    if (query is key) and (key is value):
        q2, k2, v2 = linear_split(
            flat(query), prepared["w_qkv_t"], prepared["b_qkv"],
            (inner, inner, inner), compute_dtype=compute_dtype)
    elif key is value:
        q2 = linear(flat(query), prepared["w_q_t"], prepared["b_q"],
                    compute_dtype=compute_dtype)
        k2, v2 = linear_split(
            flat(key), prepared["w_kv_t"], prepared["b_kv"],
            (inner, inner), compute_dtype=compute_dtype)
    else:
        q2 = linear(flat(query), prepared["w_q_t"], prepared["b_q"],
                    compute_dtype=compute_dtype)
        k2 = linear(flat(key), prepared["w_k_t"], prepared["b_k"],
                    compute_dtype=compute_dtype)
        v2 = linear(flat(value), prepared["w_v_t"], prepared["b_v"],
                    compute_dtype=compute_dtype)

    # Stay in (B, S, H*Dk) layout — head split happens inside the kernel.
    q3 = q2.reshape(B, Sq, inner)
    k3 = k2.reshape(B, Sk, inner)
    v3 = v2.reshape(B, Sk, inner)

    attn, ctx = attention_core(q3, k3, v3, mask, num_heads=num_heads,
                               d_kv=d_kv, compute_dtype=compute_dtype)

    # ctx is already (B, Sq, H*Dk): feed straight into the output projection.
    hidden = linear(ctx.reshape(B * Sq, inner), prepared["w_o_t"],
                    prepared["b_o"], compute_dtype=compute_dtype)
    hidden = hidden.reshape(B, Sq, d_model)
    return {"hidden_states": hidden, "attention_weights": attn}


# ---------------------------------------------------------------------------
# Pure-JAX reference (for correctness check)
# ---------------------------------------------------------------------------
def reference_mha(params, query, key, value, mask=None,
                  *, d_model, d_kv, num_heads):
    B, Sq, _ = query.shape
    Sk = key.shape[1]
    inner = num_heads * d_kv

    def lin(x, w, b):
        return x @ w.T + b

    q = lin(query, params["wq"], params["bq"]).reshape(B, Sq, num_heads, d_kv).transpose(0, 2, 1, 3)
    k = lin(key, params["wk"], params["bk"]).reshape(B, Sk, num_heads, d_kv).transpose(0, 2, 1, 3)
    v = lin(value, params["wv"], params["bv"]).reshape(B, Sk, num_heads, d_kv).transpose(0, 2, 1, 3)
    scores = jnp.einsum("bnqd,bnkd->bnqk", q, k) / jnp.sqrt(jnp.float32(d_kv))
    if mask is not None:
        scores = scores + mask
    w = jax.nn.softmax(scores, axis=-1)
    ctx = jnp.einsum("bnqk,bnkd->bnqd", w, v)
    joined = ctx.transpose(0, 2, 1, 3).reshape(B, Sq, inner)
    hidden = lin(joined, params["wo"], params["bo"])
    return {"hidden_states": hidden, "attention_weights": w}


if __name__ == "__main__":
    # Module hyperparameters (small, consistent with the PyTorch module)
    d_model, d_kv, num_heads = 32, 8, 4
    inner_dim = num_heads * d_kv
    B, S = 2, 8

    root = jax.random.PRNGKey(0)
    keys = jax.random.split(root, 16)

    def init_w(k, out_f, in_f):
        return jax.random.normal(k, (out_f, in_f), jnp.float32) * 0.05

    params = {
        "wq": init_w(keys[0], inner_dim, d_model),
        "wk": init_w(keys[1], inner_dim, d_model),
        "wv": init_w(keys[2], inner_dim, d_model),
        "wo": init_w(keys[3], d_model, inner_dim),
        "bq": jax.random.normal(keys[4], (inner_dim,), jnp.float32) * 0.01,
        "bk": jax.random.normal(keys[5], (inner_dim,), jnp.float32) * 0.01,
        "bv": jax.random.normal(keys[6], (inner_dim,), jnp.float32) * 0.01,
        "bo": jax.random.normal(keys[7], (d_model,), jnp.float32) * 0.01,
    }
    prepared = prepare_params(params)
    hp = dict(d_model=d_model, d_kv=d_kv, num_heads=num_heads)

    def check(out, ref):
        assert jnp.allclose(out["hidden_states"], ref["hidden_states"],
                            atol=1e-4, rtol=1e-4)
        assert jnp.allclose(out["attention_weights"], ref["attention_weights"],
                            atol=1e-5, rtol=1e-5)

    # 1) general path: distinct q / k / v tensors, no mask (no zeros-mask DMA)
    query = jax.random.normal(keys[8], (B, S, d_model), jnp.float32)
    key_in = jax.random.normal(keys[9], (B, S, d_model), jnp.float32)
    value = jax.random.normal(keys[10], (B, S, d_model), jnp.float32)
    out = multi_head_attention(prepared, query, key_in, value, mask=None, **hp)
    jax.block_until_ready(out["hidden_states"])
    jax.block_until_ready(out["attention_weights"])
    check(out, reference_mha(params, query, key_in, value, mask=None, **hp))

    # 2) self-attention (fused QKV projection, multi-output kernel) with an
    #    additive causal mask kept at its natural (1,1,S,S) shape.
    x = jax.random.normal(keys[11], (B, S, d_model), jnp.float32)
    causal = jnp.where(jnp.tril(jnp.ones((S, S), jnp.bool_)), 0.0, -1e9)
    causal = causal.reshape(1, 1, S, S).astype(jnp.float32)
    out2 = multi_head_attention(prepared, x, x, x, mask=causal, **hp)
    jax.block_until_ready(out2["hidden_states"])
    check(out2, reference_mha(params, x, x, x, mask=causal, **hp))

    # 3) encoder-decoder style: key is value (fused KV), longer memory sequence
    Sk = 16
    mem = jax.random.normal(keys[12], (B, Sk, d_model), jnp.float32)
    out3 = multi_head_attention(prepared, query, mem, mem, mask=None, **hp)
    jax.block_until_ready(out3["hidden_states"])
    check(out3, reference_mha(params, query, mem, mem, mask=None, **hp))

    # 4) gated bf16-operand mode (f32 accumulation): runs the same kernels
    #    with MXU-native operands; looser tolerance (not bit-exact with f32).
    out4 = multi_head_attention(prepared, x, x, x, mask=causal,
                                compute_dtype=jnp.bfloat16, **hp)
    jax.block_until_ready(out4["hidden_states"])
    ref4 = reference_mha(params, x, x, x, mask=causal, **hp)
    assert jnp.allclose(out4["hidden_states"], ref4["hidden_states"], atol=1e-1)

    print("KERNEL_OK")
</pallas_src>

<mosaic_0001>
module attributes {stable_mosaic.version = 11 : i64} {
  func.func @_linear_kernel(%arg0: i32, %arg1: i32, %arg2: i32, %arg3: memref<16x32xf32, #tpu.memory_space<vmem>>, %arg4: memref<32x32xf32, #tpu.memory_space<vmem>>, %arg5: memref<1x32xf32, #tpu.memory_space<vmem>>, %arg6: memref<16x32xf32, #tpu.memory_space<vmem>>, %arg7: memref<16x32xf32, #tpu.memory_space<vmem>>) attributes {dimension_semantics = [#tpu.dimension_semantics<parallel>, #tpu.dimension_semantics<parallel>, #tpu.dimension_semantics<arbitrary>], iteration_bounds = array<i64: 1, 1, 1>, scalar_prefetch = 0 : i64, scratch_operands = 1 : i64, tpu.core_type = #tpu.core_type<tc>, window_params = [{transform_indices = @transform_0, window_bounds = array<i64: 16, 32>}, {transform_indices = @transform_1, window_bounds = array<i64: 32, 32>}, {transform_indices = @transform_2, window_bounds = array<i64: 1, 32>}, {transform_indices = @transform_3, window_bounds = array<i64: 16, 32>}]} {
    %c0_i32 = arith.constant 0 : i32
    %0 = arith.cmpi eq, %arg2, %c0_i32 : i32
    %1 = arith.extui %0 : i1 to i32
    %c0_i32_0 = arith.constant 0 : i32
    %2 = arith.cmpi ne, %1, %c0_i32_0 : i32
    scf.if %2 {
      %cst_10 = arith.constant 0.000000e+00 : f32
      %12 = vector.broadcast %cst_10 : f32 to vector<16x32xf32>
      %c0_11 = arith.constant 0 : index
      %c0_12 = arith.constant 0 : index
      %13 = vector.load %arg7[%c0_11, %c0_12] : memref<16x32xf32, #tpu.memory_space<vmem>>, vector<16x32xf32>
      tpu.vector_store %arg7[%c0_11, %c0_12], %12 {strides = array<i32>} : memref<16x32xf32, #tpu.memory_space<vmem>>, vector<16x32xf32>,
    } else {
    }
    %c0 = arith.constant 0 : index
    %c0_1 = arith.constant 0 : index
    %3 = vector.load %arg7[%c0, %c0_1] : memref<16x32xf32, #tpu.memory_space<vmem>>, vector<16x32xf32>
    %c0_2 = arith.constant 0 : index
    %c0_3 = arith.constant 0 : index
    %4 = vector.load %arg3[%c0_2, %c0_3] : memref<16x32xf32, #tpu.memory_space<vmem>>, vector<16x32xf32>
    %c0_4 = arith.constant 0 : index
    %c0_5 = arith.constant 0 : index
    %5 = vector.load %arg4[%c0_4, %c0_5] : memref<32x32xf32, #tpu.memory_space<vmem>>, vector<32x32xf32>
    %cst = arith.constant dense<0.000000e+00> : vector<16x32xf32>
    %6 = tpu.matmul %4, %5, %cst {dimension_numbers = #tpu.dot_dimension_numbers<[1], [0], [0], [1], [0, 0, 1, 1], [], []>} : vector<16x32xf32>, vector<32x32xf32>, vector<16x32xf32> -> vector<16x32xf32>
    %7 = arith.addf %3, %6 : vector<16x32xf32>
    %c0_6 = arith.constant 0 : index
    %c0_7 = arith.constant 0 : index
    %8 = vector.load %arg7[%c0_6, %c0_7] : memref<16x32xf32, #tpu.memory_space<vmem>>, vector<16x32xf32>
    tpu.vector_store %arg7[%c0_6, %c0_7], %7 {strides = array<i32>} : memref<16x32xf32, #tpu.memory_space<vmem>>, vector<16x32xf32>,
    %c0_i32_8 = arith.constant 0 : i32
    %9 = arith.cmpi eq, %arg2, %c0_i32_8 : i32
    %10 = arith.extui %9 : i1 to i32
    %c0_i32_9 = arith.constant 0 : i32
    %11 = arith.cmpi ne, %10, %c0_i32_9 : i32
    scf.if %11 {
      %c0_10 = arith.constant 0 : index
      %c0_11 = arith.constant 0 : index
      %12 = vector.load %arg7[%c0_10, %c0_11] : memref<16x32xf32, #tpu.memory_space<vmem>>, vector<16x32xf32>
      %c0_12 = arith.constant 0 : index
      %c0_13 = arith.constant 0 : index
      %13 = vector.load %arg5[%c0_12, %c0_13] : memref<1x32xf32, #tpu.memory_space<vmem>>, vector<1x32xf32>
      %14 = vector.broadcast %13 : vector<1x32xf32> to vector<16x32xf32>
      %15 = arith.addf %12, %14 : vector<16x32xf32>
      %c0_14 = arith.constant 0 : index
      %c0_15 = arith.constant 0 : index
      %16 = vector.load %arg6[%c0_14, %c0_15] : memref<16x32xf32, #tpu.memory_space<vmem>>, vector<16x32xf32>
      tpu.vector_store %arg6[%c0_14, %c0_15], %15 {strides = array<i32>} : memref<16x32xf32, #tpu.memory_space<vmem>>, vector<16x32xf32>,
    } else {
    }
    return
  }
  func.func @transform_0(%arg0: i32, %arg1: i32, %arg2: i32) -> (i32, i32) {
    %c0_i32 = arith.constant 0 : i32
    return %arg0, %arg2 : i32, i32
  }
  func.func @transform_1(%arg0: i32, %arg1: i32, %arg2: i32) -> (i32, i32) {
    %c0_i32 = arith.constant 0 : i32
    return %arg2, %arg1 : i32, i32
  }
  func.func @transform_2(%arg0: i32, %arg1: i32, %arg2: i32) -> (i32, i32) {
    %c0_i32 = arith.constant 0 : i32
    %c0_i32_0 = arith.constant 0 : i32
    return %c0_i32, %arg1 : i32, i32
  }
  func.func @transform_3(%arg0: i32, %arg1: i32, %arg2: i32) -> (i32, i32) {
    %c0_i32 = arith.constant 0 : i32
    return %arg0, %arg1 : i32, i32
  }
}

</mosaic_0001>

<bundles_post_ra>
// kernel: tpu_custom_call.1
= control target key start
LH: loop header
LB: loop body
LE: loop exit
PB: predicated region body
PF: predicated region fallthrough
CT: control target
= control target key end

     0   :  { %8 = vsyncpa [#allocation4], 0  ;;  %s366_s0 = inlined_call_operand.hbm [shape: f32[16,32], index: 0, kind: input, shape index: {}]   ;;  %s367_s1 = inlined_call_operand.hbm [shape: f32[32,32], index: 1, kind: input, shape index: {}]   ;;  %s368_s2 = inlined_call_operand.vmem [shape: f32[1,32], index: 2, kind: input, shape index: {}]   ;;  %s369_s3 = inlined_call_operand.hbm [shape: f32[16,32], index: 3, kind: output, shape index: {}]  }
   0x1   :  { %9 = vsyncpa [#allocation7], 0 }
   0x2   :  { %10 = vsyncpa [#allocation5], 0  ;;  %s284_s12 = smov [#allocation3]   ;;  %s212_s16 = scalar_lea.hbm %s366_s0, 256 }
   0x3   :  { %s16_s13 = sshll.u32 %s284_s12, 4  ;;  %p213_p0 = scmp.ne.s32.totalorder %s366_s0, %s212_s16  ;;  %s17_s13 = int_to_ptr.vmem [resolvable:$true] %s16_s13 }
   0x4   :  { %p216_p1 = scmp.lt.u32.totalorder %s212_s16, %s366_s0 }
   0x6   :  { %p218_p2 = pnand %p216_p1, %p213_p0 }
   0x8   :  { %221 = shalt.err (!%p218_p2)
}
   0x9   :  { %s222_s21 = scalar_lea.vmem %s17_s13, 256  ;;  %p227_p4 = scmp.lt.s32.totalorder %s17_s13, %s17_s13 }
   0xa   :  { %p223_p3 = scmp.ne.s32.totalorder %s17_s13, %s222_s21  ;;  %p228_p5 = scmp.lt.s32.totalorder %s222_s21, %s222_s21 }
   0xc   :  { %p229_p6 = por %p228_p5, %p227_p4 }
   0xe   :  { %p230_p7 = pnand %p229_p6, %p223_p3 }
  0x10   :  { %233 = shalt.err (!%p230_p7)
}
  0x11   :  { %s285_s22 = smov 128   ;;  %s286_s23 = smov 8  }
  0x12   :  { %22 = dma.hbm_to_vmem [thread:$0]  %s366_s0, 256, %s17_s13, [#allocation4], %s285_s22, %s285_s22, %s286_s23  }
  0x13   :  { %s287_s26 = smov [#allocation6]   ;;  %s234_s30 = scalar_lea.hbm %s367_s1, 512 }
  0x14   :  { %s28_s27 = sshll.u32 %s287_s26, 4  ;;  %p235_p8 = scmp.ne.s32.totalorder %s367_s1, %s234_s30  ;;  %s29_s27 = int_to_ptr.vmem [resolvable:$true] %s28_s27 }
  0x15   :  { %p238_p9 = scmp.lt.u32.totalorder %s234_s30, %s367_s1 }
  0x17   :  { %p240_p10 = pnand %p238_p9, %p235_p8 }
  0x19   :  { %243 = shalt.err (!%p240_p10)
}
  0x1a   :  { %s244_s8 = scalar_lea.vmem %s29_s27, 512  ;;  %p249_p12 = scmp.lt.s32.totalorder %s29_s27, %s29_s27 }
  0x1b   :  { %p245_p11 = scmp.ne.s32.totalorder %s29_s27, %s244_s8  ;;  %p250_p13 = scmp.lt.s32.totalorder %s244_s8, %s244_s8 }
  0x1d   :  { %p251_p0 = por %p250_p13, %p249_p12 }
  0x1f   :  { %p252_p1 = pnand %p251_p0, %p245_p11 }
  0x21   :  { %255 = shalt.err (!%p252_p1)
}
  0x22   :  { %34 = dma.hbm_to_vmem [thread:$0]  %s367_s1, 512, %s29_s27, [#allocation7], %s285_s22, %s285_s22, %s286_s23  }
  0x23   :  { %278 = dma.done.wait [#allocation4], 256  }
  0x24   :  { %279 = vsyncadd [#allocation4], 4294967040 }
  0x25   :  { %280 = dma.done.wait [#allocation7], 512  }
  0x26   :  { %281 = vsyncadd [#allocation7], 4294966784  ;;  %vm47_vm0 = vcmask 261120   ;;  %v288_v0 = vmov 0.0   ;;  %v54_v1 = vld [vmem:[#allocation6] sm:$0xff]  ;;  %v55_v2 = vld [vmem:[#allocation6 + $0x8] sm:$0xff] }
  0x27   :  { %49 = vst.msk [vmem:[#allocation2 + $0x8] sm:$0xff] %vm47_vm0, %v288_v0  ;;  %48 = vst.msk [vmem:[#allocation2] sm:$0xff] %vm47_vm0, %v288_v0  ;;  %v56_v3 = vld [vmem:[#allocation6 + $0x10] sm:$0xff]  ;;  %v198_v4 = vpack.c.bf16 %v55_v2, %v54_v1  ;;  %v57_v5 = vld [vmem:[#allocation6 + $0x18] sm:$0xff]  ;;  %s289_s11 = smov [#allocation8]  }
  0x28   :  { %v52_v6 = vld [vmem:[#allocation3] sm:$0xff]  ;;  %v202_v7 = vpack.c.bf16 %v57_v5, %v56_v3  ;;  %v53_v8 = vld [vmem:[#allocation3 + $0x8] sm:$0xff]  ;;  %v180_v15 = vld [vmem:[%s368_s2] ss:$0 sm:$0xff]  ;;  %s165_s12 = sshll.u32 %s289_s11, 4  ;;  %s166_s12 = int_to_ptr.vmem [resolvable:$true] %s165_s12 }
  0x29   :  { %195 = vmatprep.mubr.msk.f32.mxu0 %vm47_vm0, %v52_v6  ;;  %199 = vmatprep.subr.bf16.mxu0 %v198_v4  ;;  %s256_s13 = scalar_lea.vmem %s166_s12, 256  ;;  %p261_p3 = scmp.lt.s32.totalorder %s166_s12, %s166_s12 }
  0x2a   :  { %201 = vmatpush3.bf16.msra.mxu0 %v198_v4  ;;  %p257_p2 = scmp.ne.s32.totalorder %s166_s12, %s256_s13  ;;  %p262_p4 = scmp.lt.s32.totalorder %s256_s13, %s256_s13 }
  0x2b   :  { %203 = vmatprep.subr.bf16.mxu0 %v202_v7 }
  0x2c   :  { %p263_p5 = por %p262_p4, %p261_p3 }
  0x2e   :  { %205 = vmatpush3.bf16.msra.mxu0 %v202_v7  ;;  %v51_v9 = vld [vmem:[#allocation2 + $0x8] sm:$0xff]  ;;  %v50_v10 = vld [vmem:[#allocation2] sm:$0xff]  ;;  %p264_p6 = pnand %p263_p5, %p257_p2 }
  0x31   :  { %196 = vmatmul.mubr.msk.f32.vlgmr.msra.gmra.mrb[0].mxu0 %vm47_vm0, %v53_v8 }
 0x104   :  { %v197_v11 = vpop.f32.mrb[0].mxu0 }
 0x105   :  { %v141_v12 = vadd.f32 %v197_v11, %v51_v9  ;;  %v131_v13 = vpop.f32.mrb[1].mxu0 }
 0x106   :  { %v140_v14 = vadd.f32 %v131_v13, %v50_v10 }
 0x107   :  { %143 = vst.msk [vmem:[#allocation2 + $0x8] sm:$0xff] %vm47_vm0, %v141_v12 }
 0x108   :  { %142 = vst.msk [vmem:[#allocation2] sm:$0xff] %vm47_vm0, %v140_v14 }
 0x10e   :  { %v148_v16 = vld [vmem:[#allocation2 + $0x8] sm:$0xff] }
 0x10f   :  { %v147_v17 = vld [vmem:[#allocation2] sm:$0xff]  ;;  %v157_v18 = vadd.f32 %v180_v15, %v148_v16 }
 0x110   :  { %v156_v19 = vadd.f32 %v180_v15, %v147_v17 }
 0x111   :  { %159 = vst.msk [vmem:[#allocation8 + $0x8] sm:$0xff] %vm47_vm0, %v157_v18 }
 0x112   :  { %158 = vst.msk [vmem:[#allocation8] sm:$0xff] %vm47_vm0, %v156_v19 }
 0x113   :  { %267 = shalt.err (!%p264_p6)
}
 0x114   :  { %s268_s15 = scalar_lea.hbm %s369_s3, 256 }
 0x115   :  { %p269_p7 = scmp.ne.s32.totalorder %s369_s3, %s268_s15  ;;  %p272_p8 = scmp.lt.u32.totalorder %s268_s15, %s369_s3 }
 0x117   :  { %p274_p9 = pnand %p272_p8, %p269_p7 }
 0x119   :  { %277 = shalt.err (!%p274_p9)
}
 0x11a   :  { %171 = dma.vmem_to_hbm [thread:$0]  %s166_s12, 256, %s369_s3, [#allocation5], %s285_s22, %s285_s22, %s286_s23  }
 0x11b   :  { %282 = dma.done.wait [#allocation5], 256  }
 0x11c   :  { %283 = vsyncadd [#allocation5], 4294967040 }
 0x11d   :  { %175 = vsyncpa [#allocation4], 1 }
 0x11e   :  { %176 = vsyncpa [#allocation7], 1 }
 0x11f   :  { %177 = vsyncpa [#allocation5], 1 }

</bundles_post_ra>
